<compile_context>
chip_gen: v5e
topology: v5e:2x2
jax: 0.10.0
libtpu: 0.0.40
codegen_flags: <defaults>
</compile_context>

<pallas_src>
import functools

import jax
import jax.numpy as jnp
from jax import lax
from jax.experimental import pallas as pl
from jax.experimental.pallas import tpu as pltpu

SCREEN_WIDTH = 800
SCREEN_HEIGHT = 600
SCALE = 0.01
SCALE2 = SCALE * SCALE
EPS = 1e-6
LR = 1e-6
# Static centering constant for the packed-coordinate matmul operand: positions
# are O(screen size); centering shrinks |x_i| in S1 = sum(x_i * wi2) and so the
# cancellation in gx = S1 - x_j*S0.  Any constant is algebraically exact.
CENTER = 0.25 * (SCREEN_WIDTH + SCREEN_HEIGHT)   # 350.0


def _round_up(x, m):
    return (x + m - 1) // m * m


def _choose_tiling(n):
    """Return (tm source tile, tn target chunk, NP padded size); NP % tm == NP % tn == 0."""
    if n <= 128:
        return 128, 128, 128                      # single grid step
    n256 = _round_up(n, 256)
    if n256 <= 1024:
        # One reduction step; exactly two target column chunks so the "parallel"
        # axis can shard across both TensorCores on v7x.
        return n256, n256 // 2, n256
    # Large N: fixed tiles, reduction axis last. 256x512 is safe on v7x's 64 MiB VMEM.
    return 256, 512, _round_up(n, 512)


def _strip_sum(x):
    """Exact-f32 sum of (TM, TN) over its 8-row sublane strips -> (8, TN).

    Static slices at sublane-tile boundaries + a pairwise add tree: pure VPU
    vreg adds, no intra-vreg sublane reduce, no masked partial stores.
    """
    tm = x.shape[0]
    parts = [x[s:s + 8, :] for s in range(0, tm, 8)]
    while len(parts) > 1:
        nxt = [parts[i] + parts[i + 1] for i in range(0, len(parts) - 1, 2)]
        if len(parts) % 2:
            nxt.append(parts[-1])
        parts = nxt
    return parts[0]


def physics_kernel(zc_ref, zr_ref, lhs_ref, znew_ref, e_ref, g_acc, *, n_valid):
    """One (target column chunk, source row tile) block of the pairwise sums.

    zc_ref  : (2, TN)  x/y of TN "target" particles (lane axis)   [resident over ra]
    zr_ref  : (TM, 2)  x/y of TM "source" particles (sublane axis)
    lhs_ref : (8, TM)  packed matmul LHS rows [1, x-c, y-c, 0...]
    znew_ref: (2, TN)  updated target positions                    [written at last ra]
    e_ref   : (8, TN)  per-target-column energy partials           [accumulator]
    g_acc   : (8, TN)  VMEM scratch: rows 0..2 accumulate S0 = sum(wi2),
              S1 = sum((x_i-c)*wi2), S2 = sum((y_i-c)*wi2) via the MXU.
    """
    cb = pl.program_id(0)          # target column chunk  -- "parallel"
    ra = pl.program_id(1)          # source row tile      -- "arbitrary" (reduction)
    tm = zr_ref.shape[0]
    tn = zc_ref.shape[1]

    @pl.when(ra == 0)
    def _init():
        g_acc[...] = jnp.zeros_like(g_acc)
        e_ref[...] = jnp.zeros_like(e_ref)

    x_row = zc_ref[0:1, :]                      # (1, TN)  target x
    y_row = zc_ref[1:2, :]                      # (1, TN)  target y
    x_col = zr_ref[:, 0:1]                      # (TM, 1)  source x
    y_col = zr_ref[:, 1:2]                      # (TM, 1)  source y

    dx = x_col - x_row                          # (TM, TN)  x_i - x_j
    dy = y_col - y_row
    denom = SCALE2 * (dx * dx + dy * dy) + EPS  # (scale * R)^2 + eps   (>= EPS > 0)
    # EUP approx reciprocal (separate issue slot) + 1 Newton step ~= f32 accuracy.
    inv_a = pl.reciprocal(denom, approx=True)
    inv = inv_a * (2.0 - denom * inv_a)         # 1/denom

    def accumulate(winv, wi2):
        # Energy: exact f32 VPU strip adds into the resident (8, TN) output block.
        e_ref[...] += _strip_sum(winv)
        # Gradient sums: single packed matmul on the otherwise-idle MXU.
        g_acc[...] += jnp.dot(lhs_ref[...], wi2, preferred_element_type=jnp.float32)

    # Scalar (SMEM) test: does this tile touch the global diagonal or padding?
    row_lo = ra * tm
    col_lo = cb * tn
    touches_diag = jnp.logical_and(row_lo < col_lo + tn, col_lo < row_lo + tm)
    touches_pad = jnp.logical_or(row_lo + tm > n_valid, col_lo + tn > n_valid)
    needs_mask = jnp.logical_or(touches_diag, touches_pad)

    @pl.when(needs_mask)
    def _edge_tile():
        # Mask: global diagonal (i == j) and padded rows/columns, built from thin
        # iotas so only the broadcasted compare/ands touch the full tile.
        ii = lax.broadcasted_iota(jnp.int32, (tm, 1), 0)
        jj = lax.broadcasted_iota(jnp.int32, (1, tn), 1)
        row_valid = (ii + row_lo) < n_valid                 # (TM, 1)
        col_valid = (jj + col_lo) < n_valid                 # (1, TN)
        off_diag = (ii - jj) != (col_lo - row_lo)           # (TM, TN)
        valid = off_diag & row_valid & col_valid
        winv = jnp.where(valid, inv, 0.0)                   # masked 1/denom
        accumulate(winv, winv * inv)                        # masked 1/denom^2

    @pl.when(jnp.logical_not(needs_mask))
    def _interior_tile():
        accumulate(inv, inv * inv)                          # mask-free fast path

    @pl.when(ra == pl.num_programs(1) - 1)
    def _finalize():
        s0 = g_acc[0:1, :]                                  # sum_i wi2
        s1 = g_acc[1:2, :]                                  # sum_i (x_i - c) wi2
        s2 = g_acc[2:3, :]                                  # sum_i (y_i - c) wi2
        xt = zc_ref[0:1, :] - CENTER
        yt = zc_ref[1:2, :] - CENTER
        gx = s1 - xt * s0                                   # sum_i (x_i - x_j) wi2
        gy = s2 - yt * s0
        # dE/dx_j = 4*scale^2 * sum_i (x_i - x_j)/denom^2 ; SGD: z -= lr * dE/dz
        coef = 4.0 * SCALE2 * LR
        znew_ref[...] = zc_ref[...] - coef * jnp.concatenate([gx, gy], axis=0)


@jax.jit
def game_physics_step(z):
    """One Game.forward() / physics() step.

    z: (N, 2) float32 positions (the torch Parameter Z).
    Returns (z_new (N, 2), total potential energy scalar).
    """
    n = z.shape[0]
    z = z.astype(jnp.float32)

    tm, tn, n_pad = _choose_tiling(max(n, 1))
    n_cb = n_pad // tn
    n_ra = n_pad // tm

    z_pad = jnp.zeros((n_pad, 2), jnp.float32).at[:n, :].set(z)  # (NP, 2) source layout
    z_cm = z_pad.T                                               # (2, NP)  target layout
    # Packed matmul LHS: rows [1, x - c, y - c, 0, ...].  Padded sources are
    # harmless: the kernel mask forces wi2 == 0 for them.
    lhs = jnp.zeros((8, n_pad), jnp.float32)
    lhs = lhs.at[0, :].set(1.0)
    lhs = lhs.at[1:3, :].set(z_cm - CENTER)

    kernel = functools.partial(physics_kernel, n_valid=n)

    znew_cm, e_part = pl.pallas_call(
        kernel,
        out_shape=(
            jax.ShapeDtypeStruct((2, n_pad), jnp.float32),   # updated positions
            jax.ShapeDtypeStruct((8, n_pad), jnp.float32),   # energy partial sums
        ),
        grid_spec=pltpu.PrefetchScalarGridSpec(
            num_scalar_prefetch=0,
            grid=(n_cb, n_ra),
            in_specs=[
                pl.BlockSpec((2, tn), lambda c, r: (0, c)),   # target chunk (resident over r)
                pl.BlockSpec((tm, 2), lambda c, r: (r, 0)),   # source row tile
                pl.BlockSpec((8, tm), lambda c, r: (0, r)),   # packed matmul LHS
            ],
            out_specs=(
                pl.BlockSpec((2, tn), lambda c, r: (0, c)),
                pl.BlockSpec((8, tn), lambda c, r: (0, c)),
            ),
            scratch_shapes=[
                pltpu.VMEM((8, tn), jnp.float32),             # S0/S1/S2 accumulator
            ],
        ),
        compiler_params=pltpu.CompilerParams(
            dimension_semantics=("parallel", "arbitrary"),
            vmem_limit_bytes=32 * 1024 * 1024,
        ),
    )(z_cm, z_pad, lhs)

    z_new = znew_cm[:, :n].T
    energy = jnp.sum(e_part)                                 # POTENTIAL ENERGY
    return z_new, energy


def _ref_energy(z):
    """Pure-JAX reference of the (intended, diagonal-masked) torch math."""
    diff = z[:, None, :] - z[None, :, :]
    d2 = jnp.sum(diff * diff, axis=-1)
    off_diag = ~jnp.eye(z.shape[0], dtype=bool)
    return jnp.sum(jnp.where(off_diag, 1.0 / (SCALE2 * d2 + EPS), 0.0))


if __name__ == "__main__":
    # N=8   -> single 128x128 tile (grid 1x1)
    # N=300 -> padded to 512: one reduction step, two 512x256 target chunks
    for n in (8, 300):
        key = jax.random.PRNGKey(0)
        # Mirrors: Z = abs(rand(N, 2)) * (SCREEN_WIDTH + SCREEN_HEIGHT) / 2
        z0 = jnp.abs(jax.random.uniform(key, (n, 2), dtype=jnp.float32)) * (
            (SCREEN_WIDTH + SCREEN_HEIGHT) / 2.0
        )

        z_new, energy = game_physics_step(z0)
        jax.block_until_ready((z_new, energy))

        e_ref = _ref_energy(z0)
        g_ref = jax.grad(_ref_energy)(z0)
        z_ref = z0 - LR * g_ref

        assert jnp.allclose(energy, e_ref, rtol=1e-4, atol=1e-5), (n, energy, e_ref)
        assert jnp.allclose(z_new, z_ref, rtol=1e-5, atol=2e-3), n

    print("KERNEL_OK")
</pallas_src>

<mosaic_0001>
module attributes {stable_mosaic.version = 11 : i64} {
  func.func @physics_kernel(%arg0: i32, %arg1: i32, %arg2: memref<2x128xf32, #tpu.memory_space<vmem>>, %arg3: memref<128x2xf32, #tpu.memory_space<vmem>>, %arg4: memref<8x128xf32, #tpu.memory_space<vmem>>, %arg5: memref<2x128xf32, #tpu.memory_space<vmem>>, %arg6: memref<8x128xf32, #tpu.memory_space<vmem>>, %arg7: memref<8x128xf32, #tpu.memory_space<vmem>>) attributes {dimension_semantics = [#tpu.dimension_semantics<parallel>, #tpu.dimension_semantics<arbitrary>], iteration_bounds = array<i64: 1, 1>, scalar_prefetch = 0 : i64, scratch_operands = 1 : i64, tpu.core_type = #tpu.core_type<tc>, window_params = [{transform_indices = @transform_0, window_bounds = array<i64: 2, 128>}, {transform_indices = @transform_1, window_bounds = array<i64: 128, 2>}, {transform_indices = @transform_2, window_bounds = array<i64: 8, 128>}, {transform_indices = @transform_3, window_bounds = array<i64: 2, 128>}, {transform_indices = @transform_4, window_bounds = array<i64: 8, 128>}]} {
    %c0_i32 = arith.constant 0 : i32
    %0 = arith.cmpi eq, %arg1, %c0_i32 : i32
    %1 = arith.extui %0 : i1 to i32
    %c0_i32_0 = arith.constant 0 : i32
    %2 = arith.cmpi ne, %1, %c0_i32_0 : i32
    scf.if %2 {
      %cst_19 = arith.constant 0.000000e+00 : f32
      %46 = vector.broadcast %cst_19 : f32 to vector<8x128xf32>
      %c0_20 = arith.constant 0 : index
      %c0_21 = arith.constant 0 : index
      %47 = vector.load %arg7[%c0_20, %c0_21] : memref<8x128xf32, #tpu.memory_space<vmem>>, vector<8x128xf32>
      tpu.vector_store %arg7[%c0_20, %c0_21], %46 {strides = array<i32>} : memref<8x128xf32, #tpu.memory_space<vmem>>, vector<8x128xf32>,
      %cst_22 = arith.constant 0.000000e+00 : f32
      %48 = vector.broadcast %cst_22 : f32 to vector<8x128xf32>
      %c0_23 = arith.constant 0 : index
      %c0_24 = arith.constant 0 : index
      %49 = vector.load %arg6[%c0_23, %c0_24] : memref<8x128xf32, #tpu.memory_space<vmem>>, vector<8x128xf32>
      tpu.vector_store %arg6[%c0_23, %c0_24], %48 {strides = array<i32>} : memref<8x128xf32, #tpu.memory_space<vmem>>, vector<8x128xf32>,
    } else {
    }
    %c0 = arith.constant 0 : index
    %c0_1 = arith.constant 0 : index
    %3 = vector.load %arg2[%c0, %c0_1] : memref<2x128xf32, #tpu.memory_space<vmem>>, vector<1x128xf32>
    %c1 = arith.constant 1 : index
    %c0_2 = arith.constant 0 : index
    %4 = vector.load %arg2[%c1, %c0_2] : memref<2x128xf32, #tpu.memory_space<vmem>>, vector<1x128xf32>
    %c0_3 = arith.constant 0 : index
    %c0_4 = arith.constant 0 : index
    %5 = vector.load %arg3[%c0_3, %c0_4] : memref<128x2xf32, #tpu.memory_space<vmem>>, vector<128x1xf32>
    %c0_5 = arith.constant 0 : index
    %c1_6 = arith.constant 1 : index
    %6 = vector.load %arg3[%c0_5, %c1_6] : memref<128x2xf32, #tpu.memory_space<vmem>>, vector<128x1xf32>
    %7 = vector.broadcast %5 : vector<128x1xf32> to vector<128x128xf32>
    %8 = vector.broadcast %3 : vector<1x128xf32> to vector<128x128xf32>
    %9 = arith.subf %7, %8 : vector<128x128xf32>
    %10 = vector.broadcast %6 : vector<128x1xf32> to vector<128x128xf32>
    %11 = vector.broadcast %4 : vector<1x128xf32> to vector<128x128xf32>
    %12 = arith.subf %10, %11 : vector<128x128xf32>
    %13 = arith.mulf %9, %9 : vector<128x128xf32>
    %14 = arith.mulf %12, %12 : vector<128x128xf32>
    %15 = arith.addf %13, %14 : vector<128x128xf32>
    %cst = arith.constant 9.99999974E-5 : f32
    %16 = vector.broadcast %cst : f32 to vector<128x128xf32>
    %17 = arith.mulf %16, %15 : vector<128x128xf32>
    %cst_7 = arith.constant 9.99999997E-7 : f32
    %18 = vector.broadcast %cst_7 : f32 to vector<128x128xf32>
    %19 = arith.addf %17, %18 : vector<128x128xf32>
    %20 = tpu.reciprocal %19 {approx = true} : vector<128x128xf32> -> vector<128x128xf32>
    %21 = arith.mulf %19, %20 : vector<128x128xf32>
    %cst_8 = arith.constant 2.000000e+00 : f32
    %22 = vector.broadcast %cst_8 : f32 to vector<128x128xf32>
    %23 = arith.subf %22, %21 : vector<128x128xf32>
    %24 = arith.mulf %20, %23 : vector<128x128xf32>
    %c128_i32 = arith.constant 128 : i32
    %25 = arith.muli %arg1, %c128_i32 : i32
    %c128_i32_9 = arith.constant 128 : i32
    %26 = arith.muli %arg0, %c128_i32_9 : i32
    %c128_i32_10 = arith.constant 128 : i32
    %27 = arith.addi %26, %c128_i32_10 : i32
    %28 = arith.cmpi slt, %25, %27 : i32
    %c128_i32_11 = arith.constant 128 : i32
    %29 = arith.addi %25, %c128_i32_11 : i32
    %30 = arith.cmpi slt, %26, %29 : i32
    %31 = arith.andi %28, %30 : i1
    %c128_i32_12 = arith.constant 128 : i32
    %32 = arith.addi %25, %c128_i32_12 : i32
    %c8_i32 = arith.constant 8 : i32
    %33 = arith.cmpi sgt, %32, %c8_i32 : i32
    %c128_i32_13 = arith.constant 128 : i32
    %34 = arith.addi %26, %c128_i32_13 : i32
    %c8_i32_14 = arith.constant 8 : i32
    %35 = arith.cmpi sgt, %34, %c8_i32_14 : i32
    %36 = arith.ori %33, %35 : i1
    %37 = arith.ori %31, %36 : i1
    %38 = arith.extui %37 : i1 to i32
    %c0_i32_15 = arith.constant 0 : i32
    %39 = arith.cmpi ne, %38, %c0_i32_15 : i32
    scf.if %39 {
      %46 = tpu.iota {dimensions = array<i32: 0>} : vector<128x1xi32>
      %47 = tpu.iota {dimensions = array<i32: 1>} : vector<1x128xi32>
      %48 = vector.broadcast %25 : i32 to vector<128x1xi32>
      %49 = arith.addi %46, %48 : vector<128x1xi32>
      %c8_i32_19 = arith.constant 8 : i32
      %50 = vector.broadcast %c8_i32_19 : i32 to vector<128x1xi32>
      %51 = arith.cmpi slt, %49, %50 : vector<128x1xi32>
      %52 = vector.broadcast %26 : i32 to vector<1x128xi32>
      %53 = arith.addi %47, %52 : vector<1x128xi32>
      %c8_i32_20 = arith.constant 8 : i32
      %54 = vector.broadcast %c8_i32_20 : i32 to vector<1x128xi32>
      %55 = arith.cmpi slt, %53, %54 : vector<1x128xi32>
      %56 = vector.broadcast %46 : vector<128x1xi32> to vector<128x128xi32>
      %57 = vector.broadcast %47 : vector<1x128xi32> to vector<128x128xi32>
      %58 = arith.subi %56, %57 : vector<128x128xi32>
      %59 = arith.subi %26, %25 : i32
      %60 = vector.broadcast %59 : i32 to vector<128x128xi32>
      %61 = arith.cmpi ne, %58, %60 : vector<128x128xi32>
      %62 = vector.broadcast %51 : vector<128x1xi1> to vector<128x128xi1>
      %63 = arith.andi %61, %62 : vector<128x128xi1>
      %64 = vector.broadcast %55 : vector<1x128xi1> to vector<128x128xi1>
      %65 = arith.andi %63, %64 : vector<128x128xi1>
      %cst_21 = arith.constant 0.000000e+00 : f32
      %66 = vector.broadcast %cst_21 : f32 to vector<128x128xf32>
      %67 = arith.select %65, %24, %66 : vector<128x128xi1>, vector<128x128xf32>
      %68 = arith.mulf %67, %24 : vector<128x128xf32>
      %c0_22 = arith.constant 0 : index
      %c0_23 = arith.constant 0 : index
      %69 = vector.load %arg6[%c0_22, %c0_23] : memref<8x128xf32, #tpu.memory_space<vmem>>, vector<8x128xf32>
      %70 = vector.extract_strided_slice %67 {offsets = [0, 0], sizes = [8, 128], strides = [1, 1]} : vector<128x128xf32> to vector<8x128xf32>
      %71 = vector.extract_strided_slice %67 {offsets = [8, 0], sizes = [8, 128], strides = [1, 1]} : vector<128x128xf32> to vector<8x128xf32>
      %72 = vector.extract_strided_slice %67 {offsets = [16, 0], sizes = [8, 128], strides = [1, 1]} : vector<128x128xf32> to vector<8x128xf32>
      %73 = vector.extract_strided_slice %67 {offsets = [24, 0], sizes = [8, 128], strides = [1, 1]} : vector<128x128xf32> to vector<8x128xf32>
      %74 = vector.extract_strided_slice %67 {offsets = [32, 0], sizes = [8, 128], strides = [1, 1]} : vector<128x128xf32> to vector<8x128xf32>
      %75 = vector.extract_strided_slice %67 {offsets = [40, 0], sizes = [8, 128], strides = [1, 1]} : vector<128x128xf32> to vector<8x128xf32>
      %76 = vector.extract_strided_slice %67 {offsets = [48, 0], sizes = [8, 128], strides = [1, 1]} : vector<128x128xf32> to vector<8x128xf32>
      %77 = vector.extract_strided_slice %67 {offsets = [56, 0], sizes = [8, 128], strides = [1, 1]} : vector<128x128xf32> to vector<8x128xf32>
      %78 = vector.extract_strided_slice %67 {offsets = [64, 0], sizes = [8, 128], strides = [1, 1]} : vector<128x128xf32> to vector<8x128xf32>
      %79 = vector.extract_strided_slice %67 {offsets = [72, 0], sizes = [8, 128], strides = [1, 1]} : vector<128x128xf32> to vector<8x128xf32>
      %80 = vector.extract_strided_slice %67 {offsets = [80, 0], sizes = [8, 128], strides = [1, 1]} : vector<128x128xf32> to vector<8x128xf32>
      %81 = vector.extract_strided_slice %67 {offsets = [88, 0], sizes = [8, 128], strides = [1, 1]} : vector<128x128xf32> to vector<8x128xf32>
      %82 = vector.extract_strided_slice %67 {offsets = [96, 0], sizes = [8, 128], strides = [1, 1]} : vector<128x128xf32> to vector<8x128xf32>
      %83 = vector.extract_strided_slice %67 {offsets = [104, 0], sizes = [8, 128], strides = [1, 1]} : vector<128x128xf32> to vector<8x128xf32>
      %84 = vector.extract_strided_slice %67 {offsets = [112, 0], sizes = [8, 128], strides = [1, 1]} : vector<128x128xf32> to vector<8x128xf32>
      %85 = vector.extract_strided_slice %67 {offsets = [120, 0], sizes = [8, 128], strides = [1, 1]} : vector<128x128xf32> to vector<8x128xf32>
      %86 = arith.addf %70, %71 : vector<8x128xf32>
      %87 = arith.addf %72, %73 : vector<8x128xf32>
      %88 = arith.addf %74, %75 : vector<8x128xf32>
      %89 = arith.addf %76, %77 : vector<8x128xf32>
      %90 = arith.addf %78, %79 : vector<8x128xf32>
      %91 = arith.addf %80, %81 : vector<8x128xf32>
      %92 = arith.addf %82, %83 : vector<8x128xf32>
      %93 = arith.addf %84, %85 : vector<8x128xf32>
      %94 = arith.addf %86, %87 : vector<8x128xf32>
      %95 = arith.addf %88, %89 : vector<8x128xf32>
      %96 = arith.addf %90, %91 : vector<8x128xf32>
      %97 = arith.addf %92, %93 : vector<8x128xf32>
      %98 = arith.addf %94, %95 : vector<8x128xf32>
      %99 = arith.addf %96, %97 : vector<8x128xf32>
      %100 = arith.addf %98, %99 : vector<8x128xf32>
      %101 = arith.addf %69, %100 : vector<8x128xf32>
      %c0_24 = arith.constant 0 : index
      %c0_25 = arith.constant 0 : index
      %102 = vector.load %arg6[%c0_24, %c0_25] : memref<8x128xf32, #tpu.memory_space<vmem>>, vector<8x128xf32>
      tpu.vector_store %arg6[%c0_24, %c0_25], %101 {strides = array<i32>} : memref<8x128xf32, #tpu.memory_space<vmem>>, vector<8x128xf32>,
      %c0_26 = arith.constant 0 : index
      %c0_27 = arith.constant 0 : index
      %103 = vector.load %arg7[%c0_26, %c0_27] : memref<8x128xf32, #tpu.memory_space<vmem>>, vector<8x128xf32>
      %c0_28 = arith.constant 0 : index
      %c0_29 = arith.constant 0 : index
      %104 = vector.load %arg4[%c0_28, %c0_29] : memref<8x128xf32, #tpu.memory_space<vmem>>, vector<8x128xf32>
      %cst_30 = arith.constant dense<0.000000e+00> : vector<8x128xf32>
      %105 = tpu.matmul %104, %68, %cst_30 {dimension_numbers = #tpu.dot_dimension_numbers<[1], [0], [0], [1], [0, 0, 1, 1], [], []>} : vector<8x128xf32>, vector<128x128xf32>, vector<8x128xf32> -> vector<8x128xf32>
      %106 = arith.addf %103, %105 : vector<8x128xf32>
      %c0_31 = arith.constant 0 : index
      %c0_32 = arith.constant 0 : index
      %107 = vector.load %arg7[%c0_31, %c0_32] : memref<8x128xf32, #tpu.memory_space<vmem>>, vector<8x128xf32>
      tpu.vector_store %arg7[%c0_31, %c0_32], %106 {strides = array<i32>} : memref<8x128xf32, #tpu.memory_space<vmem>>, vector<8x128xf32>,
    } else {
    }
    %true = arith.constant true
    %40 = arith.xori %37, %true : i1
    %41 = arith.extui %40 : i1 to i32
    %c0_i32_16 = arith.constant 0 : i32
    %42 = arith.cmpi ne, %41, %c0_i32_16 : i32
    scf.if %42 {
      %46 = arith.mulf %24, %24 : vector<128x128xf32>
      %c0_19 = arith.constant 0 : index
      %c0_20 = arith.constant 0 : index
      %47 = vector.load %arg6[%c0_19, %c0_20] : memref<8x128xf32, #tpu.memory_space<vmem>>, vector<8x128xf32>
      %48 = vector.extract_strided_slice %24 {offsets = [0, 0], sizes = [8, 128], strides = [1, 1]} : vector<128x128xf32> to vector<8x128xf32>
      %49 = vector.extract_strided_slice %24 {offsets = [8, 0], sizes = [8, 128], strides = [1, 1]} : vector<128x128xf32> to vector<8x128xf32>
      %50 = vector.extract_strided_slice %24 {offsets = [16, 0], sizes = [8, 128], strides = [1, 1]} : vector<128x128xf32> to vector<8x128xf32>
      %51 = vector.extract_strided_slice %24 {offsets = [24, 0], sizes = [8, 128], strides = [1, 1]} : vector<128x128xf32> to vector<8x128xf32>
      %52 = vector.extract_strided_slice %24 {offsets = [32, 0], sizes = [8, 128], strides = [1, 1]} : vector<128x128xf32> to vector<8x128xf32>
      %53 = vector.extract_strided_slice %24 {offsets = [40, 0], sizes = [8, 128], strides = [1, 1]} : vector<128x128xf32> to vector<8x128xf32>
      %54 = vector.extract_strided_slice %24 {offsets = [48, 0], sizes = [8, 128], strides = [1, 1]} : vector<128x128xf32> to vector<8x128xf32>
      %55 = vector.extract_strided_slice %24 {offsets = [56, 0], sizes = [8, 128], strides = [1, 1]} : vector<128x128xf32> to vector<8x128xf32>
      %56 = vector.extract_strided_slice %24 {offsets = [64, 0], sizes = [8, 128], strides = [1, 1]} : vector<128x128xf32> to vector<8x128xf32>
      %57 = vector.extract_strided_slice %24 {offsets = [72, 0], sizes = [8, 128], strides = [1, 1]} : vector<128x128xf32> to vector<8x128xf32>
      %58 = vector.extract_strided_slice %24 {offsets = [80, 0], sizes = [8, 128], strides = [1, 1]} : vector<128x128xf32> to vector<8x128xf32>
      %59 = vector.extract_strided_slice %24 {offsets = [88, 0], sizes = [8, 128], strides = [1, 1]} : vector<128x128xf32> to vector<8x128xf32>
      %60 = vector.extract_strided_slice %24 {offsets = [96, 0], sizes = [8, 128], strides = [1, 1]} : vector<128x128xf32> to vector<8x128xf32>
      %61 = vector.extract_strided_slice %24 {offsets = [104, 0], sizes = [8, 128], strides = [1, 1]} : vector<128x128xf32> to vector<8x128xf32>
      %62 = vector.extract_strided_slice %24 {offsets = [112, 0], sizes = [8, 128], strides = [1, 1]} : vector<128x128xf32> to vector<8x128xf32>
      %63 = vector.extract_strided_slice %24 {offsets = [120, 0], sizes = [8, 128], strides = [1, 1]} : vector<128x128xf32> to vector<8x128xf32>
      %64 = arith.addf %48, %49 : vector<8x128xf32>
      %65 = arith.addf %50, %51 : vector<8x128xf32>
      %66 = arith.addf %52, %53 : vector<8x128xf32>
      %67 = arith.addf %54, %55 : vector<8x128xf32>
      %68 = arith.addf %56, %57 : vector<8x128xf32>
      %69 = arith.addf %58, %59 : vector<8x128xf32>
      %70 = arith.addf %60, %61 : vector<8x128xf32>
      %71 = arith.addf %62, %63 : vector<8x128xf32>
      %72 = arith.addf %64, %65 : vector<8x128xf32>
      %73 = arith.addf %66, %67 : vector<8x128xf32>
      %74 = arith.addf %68, %69 : vector<8x128xf32>
      %75 = arith.addf %70, %71 : vector<8x128xf32>
      %76 = arith.addf %72, %73 : vector<8x128xf32>
      %77 = arith.addf %74, %75 : vector<8x128xf32>
      %78 = arith.addf %76, %77 : vector<8x128xf32>
      %79 = arith.addf %47, %78 : vector<8x128xf32>
      %c0_21 = arith.constant 0 : index
      %c0_22 = arith.constant 0 : index
      %80 = vector.load %arg6[%c0_21, %c0_22] : memref<8x128xf32, #tpu.memory_space<vmem>>, vector<8x128xf32>
      tpu.vector_store %arg6[%c0_21, %c0_22], %79 {strides = array<i32>} : memref<8x128xf32, #tpu.memory_space<vmem>>, vector<8x128xf32>,
      %c0_23 = arith.constant 0 : index
      %c0_24 = arith.constant 0 : index
      %81 = vector.load %arg7[%c0_23, %c0_24] : memref<8x128xf32, #tpu.memory_space<vmem>>, vector<8x128xf32>
      %c0_25 = arith.constant 0 : index
      %c0_26 = arith.constant 0 : index
      %82 = vector.load %arg4[%c0_25, %c0_26] : memref<8x128xf32, #tpu.memory_space<vmem>>, vector<8x128xf32>
      %cst_27 = arith.constant dense<0.000000e+00> : vector<8x128xf32>
      %83 = tpu.matmul %82, %46, %cst_27 {dimension_numbers = #tpu.dot_dimension_numbers<[1], [0], [0], [1], [0, 0, 1, 1], [], []>} : vector<8x128xf32>, vector<128x128xf32>, vector<8x128xf32> -> vector<8x128xf32>
      %84 = arith.addf %81, %83 : vector<8x128xf32>
      %c0_28 = arith.constant 0 : index
      %c0_29 = arith.constant 0 : index
      %85 = vector.load %arg7[%c0_28, %c0_29] : memref<8x128xf32, #tpu.memory_space<vmem>>, vector<8x128xf32>
      tpu.vector_store %arg7[%c0_28, %c0_29], %84 {strides = array<i32>} : memref<8x128xf32, #tpu.memory_space<vmem>>, vector<8x128xf32>,
    } else {
    }
    %c0_i32_17 = arith.constant 0 : i32
    %43 = arith.cmpi eq, %arg1, %c0_i32_17 : i32
    %44 = arith.extui %43 : i1 to i32
    %c0_i32_18 = arith.constant 0 : i32
    %45 = arith.cmpi ne, %44, %c0_i32_18 : i32
    scf.if %45 {
      %c0_19 = arith.constant 0 : index
      %c0_20 = arith.constant 0 : index
      %46 = vector.load %arg7[%c0_19, %c0_20] : memref<8x128xf32, #tpu.memory_space<vmem>>, vector<1x128xf32>
      %c1_21 = arith.constant 1 : index
      %c0_22 = arith.constant 0 : index
      %47 = vector.load %arg7[%c1_21, %c0_22] : memref<8x128xf32, #tpu.memory_space<vmem>>, vector<1x128xf32>
      %c2 = arith.constant 2 : index
      %c0_23 = arith.constant 0 : index
      %48 = vector.load %arg7[%c2, %c0_23] : memref<8x128xf32, #tpu.memory_space<vmem>>, vector<1x128xf32>
      %c0_24 = arith.constant 0 : index
      %c0_25 = arith.constant 0 : index
      %49 = vector.load %arg2[%c0_24, %c0_25] : memref<2x128xf32, #tpu.memory_space<vmem>>, vector<1x128xf32>
      %cst_26 = arith.constant 3.500000e+02 : f32
      %50 = vector.broadcast %cst_26 : f32 to vector<1x128xf32>
      %51 = arith.subf %49, %50 : vector<1x128xf32>
      %c1_27 = arith.constant 1 : index
      %c0_28 = arith.constant 0 : index
      %52 = vector.load %arg2[%c1_27, %c0_28] : memref<2x128xf32, #tpu.memory_space<vmem>>, vector<1x128xf32>
      %cst_29 = arith.constant 3.500000e+02 : f32
      %53 = vector.broadcast %cst_29 : f32 to vector<1x128xf32>
      %54 = arith.subf %52, %53 : vector<1x128xf32>
      %55 = arith.mulf %51, %46 : vector<1x128xf32>
      %56 = arith.subf %47, %55 : vector<1x128xf32>
      %57 = arith.mulf %54, %46 : vector<1x128xf32>
      %58 = arith.subf %48, %57 : vector<1x128xf32>
      %c0_30 = arith.constant 0 : index
      %c0_31 = arith.constant 0 : index
      %59 = vector.load %arg2[%c0_30, %c0_31] : memref<2x128xf32, #tpu.memory_space<vmem>>, vector<2x128xf32>
      %60 = tpu.concatenate %56, %58 in 0 : vector<1x128xf32>, vector<1x128xf32> -> vector<2x128xf32>
      %cst_32 = arith.constant 4.000000e-10 : f32
      %61 = vector.broadcast %cst_32 : f32 to vector<2x128xf32>
      %62 = arith.mulf %61, %60 : vector<2x128xf32>
      %63 = arith.subf %59, %62 : vector<2x128xf32>
      %c0_33 = arith.constant 0 : index
      %c0_34 = arith.constant 0 : index
      %64 = vector.load %arg5[%c0_33, %c0_34] : memref<2x128xf32, #tpu.memory_space<vmem>>, vector<2x128xf32>
      tpu.vector_store %arg5[%c0_33, %c0_34], %63 {strides = array<i32>} : memref<2x128xf32, #tpu.memory_space<vmem>>, vector<2x128xf32>,
    } else {
    }
    return
  }
  func.func @transform_0(%arg0: i32, %arg1: i32) -> (i32, i32) {
    %c0_i32 = arith.constant 0 : i32
    %c0_i32_0 = arith.constant 0 : i32
    return %c0_i32, %arg0 : i32, i32
  }
  func.func @transform_1(%arg0: i32, %arg1: i32) -> (i32, i32) {
    %c0_i32 = arith.constant 0 : i32
    %c0_i32_0 = arith.constant 0 : i32
    return %arg1, %c0_i32 : i32, i32
  }
  func.func @transform_2(%arg0: i32, %arg1: i32) -> (i32, i32) {
    %c0_i32 = arith.constant 0 : i32
    %c0_i32_0 = arith.constant 0 : i32
    return %c0_i32, %arg1 : i32, i32
  }
  func.func @transform_3(%arg0: i32, %arg1: i32) -> (i32, i32) {
    %c0_i32 = arith.constant 0 : i32
    %c0_i32_0 = arith.constant 0 : i32
    return %c0_i32, %arg0 : i32, i32
  }
  func.func @transform_4(%arg0: i32, %arg1: i32) -> (i32, i32) {
    %c0_i32 = arith.constant 0 : i32
    %c0_i32_0 = arith.constant 0 : i32
    return %c0_i32, %arg0 : i32, i32
  }
}

</mosaic_0001>

<bundles_post_ra>
// kernel: game_physics_step.1
= control target key start
LH: loop header
LB: loop body
LE: loop exit
PB: predicated region body
PF: predicated region fallthrough
CT: control target
= control target key end

     0   :  { %v756_v0 = vmov 0   ;;  %v757_v5 = vmov 1   ;;  %vm685_vm3 = vcmask 1040384   ;;  %s907_s1 = inlined_call_operand.vmem [shape: f32[128,2], index: 1, kind: input, shape index: {}]   ;;  %s908_s0 = inlined_call_operand.vmem [shape: f32[2,128], index: 0, kind: input, shape index: {}]   ;;  %s909_s2 = inlined_call_operand.vmem [shape: f32[8,128], index: 2, kind: input, shape index: {}]   ;;  %s910_s4 = inlined_call_operand.vmem [shape: f32[8,128], index: 4, kind: output, shape index: {1}]   ;;  %s911_s3 = inlined_call_operand.vmem [shape: f32[2,128], index: 3, kind: output, shape index: {0}]  }
   0x1   :  { %704 = vset.pattern.permute.xlu1 %v756_v0  ;;  %703 = vset.pattern.permute.xlu0 %v756_v0  ;;  %v39_v1 = vld [vmem:[%s907_s1 + $0x78] sm:$0xff]  ;;  %v38_v2 = vld [vmem:[%s907_s1 + $0x70] sm:$0xff]  ;;  %v37_v3 = vld [vmem:[%s907_s1 + $0x68] sm:$0xff] }
   0x2   :  { %117 = vperm.xlu0 %703, %v39_v1   ;;  %112 = vperm.xlu1 %704, %v38_v2   ;;  %v35_v4 = vld [vmem:[%s907_s1 + $0x58] sm:$0xff]  ;;  %v30_v6 = vld [vmem:[%s907_s1 + $0x30] sm:$0xff]  ;;  %v36_v7 = vld [vmem:[%s907_s1 + $0x60] sm:$0xff] }
   0x3   :  { %706 = vset.pattern.permute.xlu2 %v756_v0  ;;  %v34_v8 = vld [vmem:[%s907_s1 + $0x50] sm:$0xff]  ;;  %v33_v9 = vld [vmem:[%s907_s1 + $0x48] sm:$0xff]  ;;  %v28_v10 = vld [vmem:[%s907_s1 + $0x20] sm:$0xff] }
   0x4   :  { %107 = vperm.xlu2 %706, %v37_v3   ;;  %v32_v11 = vld [vmem:[%s907_s1 + $0x40] sm:$0xff]  ;;  %v31_v12 = vld [vmem:[%s907_s1 + $0x38] sm:$0xff]  ;;  %v29_v13 = vld [vmem:[%s907_s1 + $0x28] sm:$0xff] }
   0x5   :  { %v25_v14 = vld [vmem:[%s907_s1 + $0x8] sm:$0xff]  ;;  %v27_v15 = vld [vmem:[%s907_s1 + $0x18] sm:$0xff]  ;;  %v26_v16 = vld [vmem:[%s907_s1 + $0x10] sm:$0xff] }
   0x6   :  { %v24_v18 = vld [vmem:[%s907_s1] sm:$0xff] }
   0x7   :  { %v844_v24 = vld [vmem:[%s908_s0 + $0x1] ss:$0 sm:$0xff]  ;;  %v849_v25 = vld [vmem:[%s908_s0] ss:$0 sm:$0xff] }
   0xa   :  { %705 = vset.pattern.permute.xlu1 %v757_v5  ;;  %97 = vperm.xlu0 %703, %v35_v4  }
   0xb   :  { %194 = vperm.xlu1 %705, %v38_v2  }
   0xc   :  { %707 = vset.pattern.permute.xlu2 %v757_v5 }
   0xd   :  { %190 = vperm.xlu2 %707, %v37_v3  }
  0x12   :  { %72 = vperm.xlu0 %703, %v30_v6  }
  0x13   :  { %708 = vset.pattern.permute.xlu1 %v756_v0 }
  0x14   :  { %102 = vperm.xlu1 %708, %v36_v7  }
  0x15   :  { %186 = vperm.xlu2 %707, %v36_v7  }
  0x1a   :  { %713 = vset.pattern.permute.xlu0 %v757_v5 }
  0x1b   :  { %198 = vperm.xlu0 %713, %v39_v1  }
  0x1c   :  { %709 = vset.pattern.permute.xlu1 %v757_v5 }
  0x1d   :  { %182 = vperm.xlu1 %709, %v35_v4   ;;  %710 = vset.pattern.permute.xlu2 %v756_v0 }
  0x1e   :  { %92 = vperm.xlu2 %710, %v34_v8  }
  0x23   :  { %174 = vperm.xlu0 %713, %v33_v9  }
  0x25   :  { %178 = vperm.xlu1 %709, %v34_v8  }
  0x26   :  { %87 = vperm.xlu2 %710, %v33_v9  }
  0x2b   :  { %154 = vperm.xlu0 %713, %v28_v10  }
  0x2d   :  { %711 = vset.pattern.permute.xlu1 %v756_v0 }
  0x2e   :  { %82 = vperm.xlu1 %711, %v32_v11   ;;  %712 = vset.pattern.permute.xlu2 %v757_v5 }
  0x2f   :  { %170 = vperm.xlu2 %712, %v32_v11  }
  0x33   :  { %718 = vset.pattern.permute.xlu0 %v756_v0 }
  0x34   :  { %47 = vperm.xlu0 %718, %v25_v14  }
  0x36   :  { %77 = vperm.xlu1 %711, %v31_v12  }
  0x37   :  { %166 = vperm.xlu2 %712, %v31_v12  }
  0x3c   :  { %721 = vset.pattern.permute.xlu0 %v757_v5 }
  0x3e   :  { %714 = vset.pattern.permute.xlu1 %v757_v5 }
  0x3f   :  { %162 = vperm.xlu1 %714, %v30_v6   ;;  %715 = vset.pattern.permute.xlu2 %v756_v0 }
  0x40   :  { %67 = vperm.xlu2 %715, %v29_v13  }
  0x47   :  { %158 = vperm.xlu1 %714, %v29_v13  }
  0x48   :  { %62 = vperm.xlu2 %715, %v28_v10  }
  0x4f   :  { %716 = vset.pattern.permute.xlu1 %v756_v0 }
  0x50   :  { %57 = vperm.xlu1 %716, %v27_v15   ;;  %717 = vset.pattern.permute.xlu2 %v757_v5 }
  0x51   :  { %150 = vperm.xlu2 %717, %v27_v15  }
  0x58   :  { %52 = vperm.xlu1 %716, %v26_v16  }
  0x59   :  { %146 = vperm.xlu2 %717, %v26_v16  }
  0x5e   :  { %v108_v17 = vpop.permute.xlu2 %107 }
  0x5f   :  { %v134_v29 = vsub.f32 %v108_v17, %v849_v25 }
  0x60   :  { %719 = vset.pattern.permute.xlu1 %v757_v5 }
  0x61   :  { %142 = vperm.xlu1 %719, %v25_v14   ;;  %720 = vset.pattern.permute.xlu2 %v756_v0  ;;  %v231_v34 = vmul.f32 %v134_v29, %v134_v29 }
  0x62   :  { %42 = vperm.xlu2 %720, %v24_v18  }
  0x67   :  { %v191_v19 = vpop.permute.xlu2 %190 }
  0x68   :  { %v215_v30 = vsub.f32 %v191_v19, %v844_v24 }
  0x69   :  { %138 = vperm.xlu1 %719, %v24_v18  }
  0x6a   :  { %v247_v35 = vmul.f32 %v215_v30, %v215_v30 }
  0x6c   :  { %v263_v41 = vadd.f32 %v247_v35, %v231_v34 }
  0x6e   :  { %v279_v48 = vmul.f32 0.0001, %v263_v41 }
  0x6f   :  { %v187_v20 = vpop.permute.xlu2 %186 }
  0x70   :  { %v214_v36 = vsub.f32 %v187_v20, %v844_v24  ;;  %v295_v56 = vadd.f32 1e-06, %v279_v48 }
  0x72   :  { %v246_v42 = vmul.f32 %v214_v36, %v214_v36 }
  0x74   :  { %v113_v21 = vpop.permute.xlu1 %112  ;;  %v118_v22 = vpop.permute.xlu0 %117 }
  0x75   :  { %v135_v31 = vsub.f32 %v113_v21, %v849_v25  ;;  %v136_v46 = vsub.f32 %v118_v22, %v849_v25 }
  0x77   :  { %v232_v37 = vmul.f32 %v135_v31, %v135_v31  ;;  %v233_v52 = vmul.f32 %v136_v46, %v136_v46 }
  0x78   :  { %v93_v23 = vpop.permute.xlu2 %92 }
  0x79   :  { %v131_v1 = vsub.f32 %v93_v23, %v849_v25 }
  0x7b   :  { %v228_v10 = vmul.f32 %v131_v1, %v131_v1 }
  0x7c   :  { %v98_v26 = vpop.permute.xlu0 %97 }
  0x7d   :  { %v195_v27 = vpop.permute.xlu1 %194  ;;  %v132_v50 = vsub.f32 %v98_v26, %v849_v25 }
  0x7e   :  { %v216_v28 = vsub.f32 %v195_v27, %v844_v24 }
  0x7f   :  { %v229_v58 = vmul.f32 %v132_v50, %v132_v50 }
  0x80   :  { %v88_v32 = vpop.permute.xlu2 %87  ;;  %v248_v33 = vmul.f32 %v216_v28, %v216_v28 }
  0x81   :  { %v130_v61 = vsub.f32 %v88_v32, %v849_v25 }
  0x82   :  { %v264_v39 = vadd.f32 %v248_v33, %v232_v37 }
  0x83   :  { %v227_v5 = vmul.f32 %v130_v61, %v130_v61 }
  0x84   :  { %v856_v38 = vpop.permute.xlu0 %72  ;;  %v280_v47 = vmul.f32 0.0001, %v264_v39 }
  0x86   :  { %v103_v40 = vpop.permute.xlu1 %102  ;;  %v296_v53 = vadd.f32 1e-06, %v280_v47 }
  0x87   :  { %v133_v43 = vsub.f32 %v103_v40, %v849_v25 }
  0x88   :  { %724 = vrcp.f32 %v296_v53 }
  0x89   :  { %v230_v44 = vmul.f32 %v133_v43, %v133_v43  ;;  %v171_v45 = vpop.permute.xlu2 %170  ;;  %726 = vrcp.f32 %v295_v56 }
  0x8a   :  { %v210_v26 = vsub.f32 %v171_v45, %v844_v24 }
  0x8b   :  { %v262_v49 = vadd.f32 %v246_v42, %v230_v44 }
  0x8c   :  { %v242_v39 = vmul.f32 %v210_v26, %v210_v26 }
  0x8d   :  { %v199_v51 = vpop.permute.xlu0 %198  ;;  %v278_v54 = vmul.f32 0.0001, %v262_v49 }
  0x8e   :  { %v217_v55 = vsub.f32 %v199_v51, %v844_v24  ;;  %v725_v12 = vpop.eup %724 }
  0x8f   :  { %v183_v57 = vpop.permute.xlu1 %182  ;;  %v294_v62 = vadd.f32 1e-06, %v278_v54  ;;  %v727_v16 = vpop.eup %726  ;;  %v328_v19 = vmul.f32 %v725_v12, %v296_v53 }
  0x90   :  { %v249_v59 = vmul.f32 %v217_v55, %v217_v55  ;;  %v213_v60 = vsub.f32 %v183_v57, %v844_v24  ;;  %v327_v23 = vmul.f32 %v727_v16, %v295_v56 }
  0x91   :  { %v167_v2 = vpop.permute.xlu2 %166  ;;  %728 = vrcp.f32 %v294_v62  ;;  %v344_v32 = vsub.f32 2.0, %v328_v19 }
  0x92   :  { %v265_v63 = vadd.f32 %v249_v59, %v233_v52  ;;  %v245_v0 = vmul.f32 %v213_v60, %v213_v60  ;;  %v343_v37 = vsub.f32 2.0, %v327_v23  ;;  %v209_v47 = vsub.f32 %v167_v2, %v844_v24 }
  0x93   :  { %v360_v45 = vmul.f32 %v725_v12, %v344_v32 }
  0x94   :  { %v281_v3 = vmul.f32 0.0001, %v265_v63  ;;  %v261_v4 = vadd.f32 %v245_v0, %v229_v58  ;;  %v359_v48 = vmul.f32 %v727_v16, %v343_v37  ;;  %v241_v60 = vmul.f32 %v209_v47, %v209_v47 }
  0x95   :  { %v175_v6 = vpop.permute.xlu0 %174  ;;  %v562_v54 = vmul.f32 0.0, %v360_v45 }
  0x96   :  { %v297_v7 = vadd.f32 1e-06, %v281_v3  ;;  %v277_v8 = vmul.f32 0.0001, %v261_v4  ;;  %v211_v9 = vsub.f32 %v175_v6, %v844_v24 }
  0x97   :  { %v179_v11 = vpop.permute.xlu1 %178  ;;  %v729_v20 = vpop.eup %728 }
  0x98   :  { %730 = vrcp.f32 %v297_v7  ;;  %v293_v13 = vadd.f32 1e-06, %v277_v8  ;;  %v243_v14 = vmul.f32 %v211_v9, %v211_v9  ;;  %v212_v15 = vsub.f32 %v179_v11, %v844_v24 }
  0x99   :  { %v326_v33 = vmul.f32 %v729_v20, %v294_v62  ;;  %v561_v62 = vmul.f32 0.0, %v359_v48 }
  0x9a   :  { %732 = vrcp.f32 %v293_v13  ;;  %v259_v17 = vadd.f32 %v243_v14, %v227_v5  ;;  %v244_v18 = vmul.f32 %v212_v15, %v212_v15  ;;  %v868_v27 = vpop.permute.xlu2 %67 }
  0x9b   :  { %v342_v46 = vsub.f32 2.0, %v326_v33 }
  0x9c   :  { %v275_v21 = vmul.f32 0.0001, %v259_v17  ;;  %v260_v22 = vadd.f32 %v244_v18, %v228_v10  ;;  %v127_v17 = vsub.f32 %v856_v38, %v849_v25 }
  0x9d   :  { %v358_v55 = vmul.f32 %v729_v20, %v342_v46  ;;  %v155_v56 = vpop.permute.xlu0 %154 }
  0x9e   :  { %v731_v28 = vpop.eup %730  ;;  %v291_v29 = vadd.f32 1e-06, %v275_v21  ;;  %v276_v30 = vmul.f32 0.0001, %v260_v22  ;;  %v206_v3 = vsub.f32 %v155_v56, %v844_v24 }
  0x9f   :  { %v329_v31 = vmul.f32 %v731_v28, %v297_v7  ;;  %v560_v7 = vmul.f32 0.0, %v358_v55 }
  0xa0   :  { %v733_v34 = vpop.eup %732  ;;  %734 = vrcp.f32 %v291_v29  ;;  %v292_v35 = vadd.f32 1e-06, %v276_v30  ;;  %v83_v36 = vpop.permute.xlu1 %82 }
  0xa1   :  { %v129_v40 = vsub.f32 %v83_v36, %v849_v25  ;;  %v345_v41 = vsub.f32 2.0, %v329_v31  ;;  %v325_v42 = vmul.f32 %v733_v34, %v293_v13  ;;  %v238_v13 = vmul.f32 %v206_v3, %v206_v3 }
  0xa2   :  { %736 = vrcp.f32 %v292_v35  ;;  %v63_v57 = vpop.permute.xlu2 %62  ;;  %v126_v31 = vsub.f32 %v868_v27, %v849_v25 }
  0xa3   :  { %v226_v43 = vmul.f32 %v129_v40, %v129_v40  ;;  %v361_v44 = vmul.f32 %v731_v28, %v345_v41  ;;  %v341_v51 = vsub.f32 2.0, %v325_v42  ;;  %v125_v4 = vsub.f32 %v63_v57, %v849_v25 }
  0xa4   :  { %v224_v28 = vmul.f32 %v127_v17, %v127_v17  ;;  %v223_v37 = vmul.f32 %v126_v31, %v126_v31 }
  0xa5   :  { %v258_v49 = vadd.f32 %v242_v39, %v226_v43  ;;  %v563_v50 = vmul.f32 0.0, %v361_v44  ;;  %v357_v1 = vmul.f32 %v733_v34, %v341_v51  ;;  %v222_v14 = vmul.f32 %v125_v4, %v125_v4 }
  0xa6   :  { %v735_v52 = vpop.eup %734 }
  0xa7   :  { %v274_v53 = vmul.f32 0.0001, %v258_v49  ;;  %584 = vmatpush.msra.mxu0 %v563_v50  ;;  %v323_v58 = vmul.f32 %v735_v52, %v291_v29  ;;  %v559_v10 = vmul.f32 0.0, %v357_v1  ;;  %v254_v23 = vadd.f32 %v238_v13, %v222_v14 }
  0xa8   :  { %v737_v59 = vpop.eup %736  ;;  %v78_v61 = vpop.permute.xlu1 %77 }
  0xa9   :  { %v290_v63 = vadd.f32 1e-06, %v274_v53  ;;  %v128_v0 = vsub.f32 %v78_v61, %v849_v25  ;;  %585 = vmatpush.msra.mxu0 %v562_v54  ;;  %v324_v2 = vmul.f32 %v737_v59, %v292_v35  ;;  %v339_v5 = vsub.f32 2.0, %v323_v58 }
  0xaa   :  { %v270_v33 = vmul.f32 0.0001, %v254_v23 }
  0xab   :  { %738 = vrcp.f32 %v290_v63  ;;  %v225_v6 = vmul.f32 %v128_v0, %v128_v0  ;;  %586 = vmatpush.msra.mxu0 %v561_v62  ;;  %v340_v8 = vsub.f32 2.0, %v324_v2  ;;  %v355_v12 = vmul.f32 %v735_v52, %v339_v5  ;;  %v151_v40 = vpop.permute.xlu2 %150 }
  0xac   :  { %v286_v42 = vadd.f32 1e-06, %v270_v33  ;;  %v205_v48 = vsub.f32 %v151_v40, %v844_v24 }
  0xad   :  { %v257_v9 = vadd.f32 %v241_v60, %v225_v6  ;;  %587 = vmatpush.msra.mxu0 %v560_v7  ;;  %v356_v11 = vmul.f32 %v737_v59, %v340_v8  ;;  %v557_v21 = vmul.f32 0.0, %v355_v12 }
  0xae   :  { %v237_v54 = vmul.f32 %v205_v48, %v205_v48 }
  0xaf   :  { %v273_v15 = vmul.f32 0.0001, %v257_v9  ;;  %588 = vmatpush.msra.mxu0 %v559_v10  ;;  %v558_v16 = vmul.f32 0.0, %v356_v11  ;;  %v48_v11 = vpop.permute.xlu0 %47 }
  0xb1   :  { %v739_v18 = vpop.eup %738  ;;  %v289_v19 = vadd.f32 1e-06, %v273_v15  ;;  %v163_v20 = vpop.permute.xlu1 %162  ;;  %589 = vmatpush.msra.mxu0 %v558_v16  ;;  %v122_v16 = vsub.f32 %v48_v11, %v849_v25 }
  0xb2   :  { %v208_v22 = vsub.f32 %v163_v20, %v844_v24  ;;  %v322_v26 = vmul.f32 %v739_v18, %v290_v63 }
  0xb3   :  { %740 = vrcp.f32 %v289_v19  ;;  %590 = vmatpush.msra.mxu0 %v557_v21  ;;  %v147_v56 = vpop.permute.xlu2 %146 }
  0xb4   :  { %v240_v29 = vmul.f32 %v208_v22, %v208_v22  ;;  %v338_v30 = vsub.f32 2.0, %v322_v26  ;;  %v204_v61 = vsub.f32 %v147_v56, %v844_v24  ;;  %v219_v26 = vmul.f32 %v122_v16, %v122_v16 }
  0xb6   :  { %v256_v32 = vadd.f32 %v240_v29, %v224_v28  ;;  %v354_v38 = vmul.f32 %v739_v18, %v338_v30  ;;  %v236_v4 = vmul.f32 %v204_v61, %v204_v61 }
  0xb8   :  { %v272_v34 = vmul.f32 0.0001, %v256_v32  ;;  %v556_v35 = vmul.f32 0.0, %v354_v38 }
  0xb9   :  { %v741_v36 = vpop.eup %740  ;;  %v159_v39 = vpop.permute.xlu1 %158 }
  0xba   :  { %v288_v41 = vadd.f32 1e-06, %v272_v34  ;;  %v207_v43 = vsub.f32 %v159_v39, %v844_v24  ;;  %591 = vmatpush.msra.mxu0 %v556_v35  ;;  %v321_v44 = vmul.f32 %v741_v36, %v289_v19 }
  0xbc   :  { %742 = vrcp.f32 %v288_v41  ;;  %v239_v45 = vmul.f32 %v207_v43, %v207_v43  ;;  %v337_v46 = vsub.f32 2.0, %v321_v44  ;;  %v43_v29 = vpop.permute.xlu2 %42 }
  0xbd   :  { %744 = vrcp.f32 %v286_v42  ;;  %v121_v33 = vsub.f32 %v43_v29, %v849_v25 }
  0xbe   :  { %v255_v27 = vadd.f32 %v239_v45, %v223_v37  ;;  %v353_v47 = vmul.f32 %v741_v36, %v337_v46 }
  0xc0   :  { %v271_v49 = vmul.f32 0.0001, %v255_v27  ;;  %v555_v50 = vmul.f32 0.0, %v353_v47  ;;  %v377_v27 = vlaneseq }
  0xc2   :  { %v743_v51 = vpop.eup %742  ;;  %v287_v52 = vadd.f32 1e-06, %v271_v49  ;;  %v58_v53 = vpop.permute.xlu1 %57  ;;  %592 = vmatpush.msra.mxu0 %v555_v50 }
  0xc3   :  { %v124_v55 = vsub.f32 %v58_v53, %v849_v25  ;;  %v320_v57 = vmul.f32 %v743_v51, %v288_v41  ;;  %v745_v58 = vpop.eup %744  ;;  %v218_v41 = vmul.f32 %v121_v33, %v121_v33 }
  0xc4   :  { %746 = vrcp.f32 %v287_v52  ;;  %v318_v0 = vmul.f32 %v745_v58, %v286_v42 }
  0xc5   :  { %v221_v59 = vmul.f32 %v124_v55, %v124_v55  ;;  %v336_v60 = vsub.f32 2.0, %v320_v57 }
  0xc6   :  { %v334_v9 = vsub.f32 2.0, %v318_v0  ;;  %v673_v0 = vld [vmem:[%s908_s0] sm:$0x1] }
  0xc7   :  { %v253_v62 = vadd.f32 %v237_v54, %v221_v59  ;;  %v352_v63 = vmul.f32 %v743_v51, %v336_v60  ;;  %v378_v51 = vshrl.u32 %v377_v27, 7 }
  0xc8   :  { %v350_v15 = vmul.f32 %v745_v58, %v334_v9 }
  0xc9   :  { %v269_v1 = vmul.f32 0.0001, %v253_v62  ;;  %v554_v2 = vmul.f32 0.0, %v352_v63  ;;  %v583_v62 = vld [vmem:[%s909_s2] sm:$0xff] }
  0xca   :  { %v747_v3 = vpop.eup %746  ;;  %v53_v5 = vpop.permute.xlu1 %52  ;;  %v552_v22 = vmul.f32 0.0, %v350_v15 }
  0xcb   :  { %v285_v6 = vadd.f32 1e-06, %v269_v1  ;;  %v123_v7 = vsub.f32 %v53_v5, %v849_v25  ;;  %593 = vmatpush.msra.mxu0 %v554_v2  ;;  %v319_v8 = vmul.f32 %v747_v3, %v287_v52  ;;  %v395_v52 = vand.u32 127, %v377_v27  ;;  %v675_v1 = vld [vmem:[%s908_s0 + $0x1] sm:$0x1] }
  0xcc   :  { %v698_v2 = vadd.f32 -350.0, %v673_v0 }
  0xcd   :  { %748 = vrcp.f32 %v285_v6  ;;  %v220_v10 = vmul.f32 %v123_v7, %v123_v7  ;;  %v335_v12 = vsub.f32 2.0, %v319_v8  ;;  %v432_v54 = vsub.s32 %v378_v51, %v395_v52 }
  0xce   :  { %vm431_vm0 = vcmp.lt.s32.totalorder %v395_v52, 8 }
  0xcf   :  { %v252_v13 = vadd.f32 %v236_v4, %v220_v10  ;;  %v351_v14 = vmul.f32 %v747_v3, %v335_v12  ;;  %vm450_vm1 = vcmp.ne.s32.totalorder %v432_v54, 0  ;;  %v699_v3 = vadd.f32 -350.0, %v675_v1  ;;  %v681_v12 = vld [vmem:[%s908_s0] sm:$0x3] }
  0xd0   :  { %vm516_vm2 = vmand %vm450_vm1, %vm431_vm0 }
  0xd1   :  { %v268_v17 = vmul.f32 0.0001, %v252_v13  ;;  %v553_v18 = vmul.f32 0.0, %v351_v14 }
  0xd3   :  { %v749_v19 = vpop.eup %748  ;;  %v284_v20 = vadd.f32 1e-06, %v268_v17  ;;  %v143_v21 = vpop.permute.xlu1 %142  ;;  %594 = vmatpush.msra.mxu0 %v553_v18 }
  0xd4   :  { %v203_v23 = vsub.f32 %v143_v21, %v844_v24  ;;  %v317_v28 = vmul.f32 %v749_v19, %v285_v6 }
  0xd5   :  { %750 = vrcp.f32 %v284_v20  ;;  %595 = vmatpush.msra.mxu0 %v552_v22 }
  0xd6   :  { %v235_v30 = vmul.f32 %v203_v23, %v203_v23  ;;  %v333_v31 = vsub.f32 2.0, %v317_v28 }
  0xd8   :  { %v251_v32 = vadd.f32 %v235_v30, %v219_v26  ;;  %v349_v38 = vmul.f32 %v749_v19, %v333_v31 }
  0xda   :  { %v267_v34 = vmul.f32 0.0001, %v251_v32  ;;  %v551_v35 = vmul.f32 0.0, %v349_v38 }
  0xdb   :  { %v751_v36 = vpop.eup %750  ;;  %v139_v37 = vpop.permute.xlu1 %138 }
  0xdc   :  { %v283_v39 = vadd.f32 1e-06, %v267_v34  ;;  %v202_v40 = vsub.f32 %v139_v37, %v844_v24  ;;  %596 = vmatpush.msra.mxu0 %v551_v35  ;;  %v316_v42 = vmul.f32 %v751_v36, %v284_v20 }
  0xde   :  { %752 = vrcp.f32 %v283_v39  ;;  %v234_v43 = vmul.f32 %v202_v40, %v202_v40  ;;  %v332_v44 = vsub.f32 2.0, %v316_v42 }
  0xe0   :  { %v250_v45 = vadd.f32 %v234_v43, %v218_v41  ;;  %v348_v46 = vmul.f32 %v751_v36, %v332_v44 }
  0xe2   :  { %v266_v47 = vmul.f32 0.0001, %v250_v45  ;;  %v550_v48 = vmul.f32 0.0, %v348_v46 }
  0xe4   :  { %v753_v25 = vpop.eup %752  ;;  %v282_v49 = vadd.f32 1e-06, %v266_v47  ;;  %597 = vmatpush.msra.mxu0 %v550_v48 }
  0xe5   :  { %v315_v50 = vmul.f32 %v753_v25, %v283_v39 }
  0xe6   :  { %754 = vrcp.f32 %v282_v49 }
  0xe7   :  { %v331_v53 = vsub.f32 2.0, %v315_v50 }
  0xe9   :  { %v347_v24 = vmul.f32 %v753_v25, %v331_v53 }
  0xeb   :  { %v549_v55 = vmul.f32 0.0, %v347_v24 }
  0xec   :  { %v755_v56 = vpop.eup %754 }
  0xed   :  { %598 = vmatpush.msra.mxu0 %v549_v55  ;;  %v314_v57 = vmul.f32 %v755_v56, %v282_v49 }
  0xef   :  { %v330_v58 = vsub.f32 2.0, %v314_v57 }
  0xf1   :  { %v346_v59 = vmul.f32 %v755_v56, %v330_v58 }
  0xf3   :  { %v532_v60 = vsel %vm516_vm2, %v346_v59, 0.0 }
  0xf4   :  { %v548_v61 = vmul.f32 %v532_v60, %v346_v59  ;;  %581 = vst [vmem:[%s910_s4] sm:$0xff] %v532_v60 }
  0xf6   :  { %599 = vmatpush.msra.mxu0 %v548_v61 }
  0xf7   :  { %600 = vmatmul.f32.vlgmr.msra.gmra.mxu0 %v583_v62 }
 0x174   :  { %v601_v63 = vpop.f32.mrf.mxu0 }
 0x175   :  { %605 = vst [vmem:[#allocation2] sm:$0xff] %v601_v63 }
 0x17c   :  { %v670_v4 = vld [vmem:[#allocation2] sm:$0x1]  ;;  %v672_v7 = vld [vmem:[#allocation2 + $0x2] sm:$0x1]  ;;  %v671_v9 = vld [vmem:[#allocation2 + $0x1] sm:$0x1] }
 0x17d   :  { %v677_v5 = vmul.f32 %v698_v2, %v670_v4  ;;  %v679_v6 = vmul.f32 %v699_v3, %v670_v4 }
 0x17f   :  { %v680_v8 = vsub.f32 %v672_v7, %v679_v6  ;;  %v678_v10 = vsub.f32 %v671_v9, %v677_v5 }
 0x181   :  { %v683_v11 = vrot.slane %v680_v8, 7 }
 0x183   :  { %v686_v13 = vsel %vm685_vm3, %v678_v10, %v683_v11 }
 0x184   :  { %v687_v14 = vmul.f32 4e-10, %v686_v13 }
 0x186   :  { %v688_v15 = vsub.f32 %v681_v12, %v687_v14 }
 0x188   :  { %689 = vst [vmem:[%s911_s3] sm:$0x3] %v688_v15 }

</bundles_post_ra>
